<compile_context>
chip_gen: v5e
topology: v5e:2x2
jax: 0.10.0
libtpu: 0.0.40
codegen_flags: <defaults>
</compile_context>

<pallas_src>
import functools

import jax
import jax.numpy as jnp
import numpy as np
from jax.experimental import pallas as pl
from jax.experimental.pallas import tpu as pltpu

_LANES = 512        # lane-dense last dim (multiple of 128 -> unmasked vst)
_BLOCK_ROWS = 512   # 512 x 512 f32 block = 1 MiB per operand


def _rician_kernel(x_ref, n1_ref, n2_ref, o_ref, *, scale, sqrt_k):
    # |sqrt(K/(1+K)) + sqrt(1/(1+K))*(n1 + i*n2)|
    #   = sqrt(1/(1+K)) * sqrt((sqrt(K) + n1)^2 + n2^2)
    re = n1_ref[...] + jnp.float32(sqrt_k)
    im = n2_ref[...]
    mag = jnp.sqrt(re * re + im * im)
    x = x_ref[...].astype(jnp.float32)
    o_ref[...] = (x + jnp.float32(scale) * mag).astype(o_ref.dtype)


@functools.partial(jax.jit, static_argnames=("sigma", "K"))
def _rician_channel_impl(x, key, *, sigma, K):
    orig_shape = x.shape
    orig_dtype = x.dtype
    n = x.size

    # --- lay out as a lane-dense padded 2-D slab -----------------------------
    flat = x.reshape(-1)
    min_elems = 8 * _LANES                              # minimum (8,128)-legal tile
    rows = pl.cdiv(max(n, 1), min_elems) * 8            # rows is a multiple of 8
    block_rows = _BLOCK_ROWS
    if rows <= block_rows:
        block_rows = rows                               # single block for small inputs
    else:
        rows = pl.cdiv(rows, block_rows) * block_rows   # rows multiple of block_rows
    padded = rows * _LANES
    if padded != n:
        flat = jnp.pad(flat, (0, padded - n))
    x2 = flat.reshape(rows, _LANES)                     # native dtype; upcast in-kernel

    # Standard-normal real/imag fields for the whole (padded) slab.
    noise = jax.random.normal(key, (2, rows, _LANES), dtype=jnp.float32)
    n1, n2 = noise[0], noise[1]

    kernel = functools.partial(
        _rician_kernel,
        scale=float(sigma) * float(np.sqrt(1.0 / (1.0 + K))),
        sqrt_k=float(np.sqrt(K)),
    )

    spec = pl.BlockSpec((block_rows, _LANES), lambda i: (i, 0))
    out2 = pl.pallas_call(
        kernel,
        out_shape=jax.ShapeDtypeStruct((rows, _LANES), orig_dtype),
        grid=(rows // block_rows,),
        in_specs=[spec, spec, spec],
        out_specs=spec,
        compiler_params=pltpu.CompilerParams(
            dimension_semantics=("parallel",)),
    )(x2, n1, n2)

    return out2.reshape(-1)[:n].reshape(orig_shape)


def rician_channel(x, sigma, *, key=None, K=2.0):
    """Applies the Rician channel transformation elementwise to x (any shape)."""
    if key is None:
        key = jax.random.PRNGKey(0)
    return _rician_channel_impl(x, key, sigma=float(sigma), K=float(K))


if __name__ == "__main__":
    root = jax.random.PRNGKey(0)
    kx, kn = jax.random.split(root)
    # NCHW input, consistent with the conv-style tensors this module is applied to.
    x = jax.random.normal(kx, (2, 4, 16, 16), dtype=jnp.float32)

    sigma = 0.1
    K = 2.0
    y = rician_channel(x, sigma, key=kn, K=K)
    y = jax.block_until_ready(y)

    # Sanity checks (statistical, since the noise is random):
    assert y.shape == x.shape and y.dtype == x.dtype
    delta = y - x
    # E[|rician_noise|] >= sqrt(K/(1+K)) > 0, so y - x = sigma*|.| must be positive.
    assert bool(jnp.all(delta > 0.0))
    # Mean Rician magnitude with nu=sqrt(2/3), per-component std sqrt(1/3) is ~1.0.
    mean_delta = float(jnp.mean(delta)) / sigma
    assert 0.5 < mean_delta < 1.5, mean_delta

    print("KERNEL_OK")
</pallas_src>

<mosaic_0001>
module attributes {stable_mosaic.version = 11 : i64} {
  func.func @_rician_kernel(%arg0: i32, %arg1: memref<8x512xf32, #tpu.memory_space<vmem>>, %arg2: memref<8x512xf32, #tpu.memory_space<vmem>>, %arg3: memref<8x512xf32, #tpu.memory_space<vmem>>, %arg4: memref<8x512xf32, #tpu.memory_space<vmem>>) attributes {dimension_semantics = [#tpu.dimension_semantics<parallel>], iteration_bounds = array<i64: 1>, scalar_prefetch = 0 : i64, scratch_operands = 0 : i64, tpu.core_type = #tpu.core_type<tc>, window_params = [{transform_indices = @transform_0, window_bounds = array<i64: 8, 512>}, {transform_indices = @transform_1, window_bounds = array<i64: 8, 512>}, {transform_indices = @transform_2, window_bounds = array<i64: 8, 512>}, {transform_indices = @transform_3, window_bounds = array<i64: 8, 512>}]} {
    %c0 = arith.constant 0 : index
    %c0_0 = arith.constant 0 : index
    %0 = vector.load %arg2[%c0, %c0_0] : memref<8x512xf32, #tpu.memory_space<vmem>>, vector<8x512xf32>
    %cst = arith.constant 1.41421354 : f32
    %1 = vector.broadcast %cst : f32 to vector<8x512xf32>
    %2 = arith.addf %0, %1 : vector<8x512xf32>
    %c0_1 = arith.constant 0 : index
    %c0_2 = arith.constant 0 : index
    %3 = vector.load %arg3[%c0_1, %c0_2] : memref<8x512xf32, #tpu.memory_space<vmem>>, vector<8x512xf32>
    %4 = arith.mulf %2, %2 : vector<8x512xf32>
    %5 = arith.mulf %3, %3 : vector<8x512xf32>
    %6 = arith.addf %4, %5 : vector<8x512xf32>
    %7 = math.sqrt %6 : vector<8x512xf32>
    %c0_3 = arith.constant 0 : index
    %c0_4 = arith.constant 0 : index
    %8 = vector.load %arg1[%c0_3, %c0_4] : memref<8x512xf32, #tpu.memory_space<vmem>>, vector<8x512xf32>
    %cst_5 = arith.constant 0.0577350259 : f32
    %9 = vector.broadcast %cst_5 : f32 to vector<8x512xf32>
    %10 = arith.mulf %9, %7 : vector<8x512xf32>
    %11 = arith.addf %8, %10 : vector<8x512xf32>
    %c0_6 = arith.constant 0 : index
    %c0_7 = arith.constant 0 : index
    %12 = vector.load %arg4[%c0_6, %c0_7] : memref<8x512xf32, #tpu.memory_space<vmem>>, vector<8x512xf32>
    tpu.vector_store %arg4[%c0_6, %c0_7], %11 {strides = array<i32>} : memref<8x512xf32, #tpu.memory_space<vmem>>, vector<8x512xf32>,
    return
  }
  func.func @transform_0(%arg0: i32) -> (i32, i32) {
    %c0_i32 = arith.constant 0 : i32
    %c0_i32_0 = arith.constant 0 : i32
    return %arg0, %c0_i32 : i32, i32
  }
  func.func @transform_1(%arg0: i32) -> (i32, i32) {
    %c0_i32 = arith.constant 0 : i32
    %c0_i32_0 = arith.constant 0 : i32
    return %arg0, %c0_i32 : i32, i32
  }
  func.func @transform_2(%arg0: i32) -> (i32, i32) {
    %c0_i32 = arith.constant 0 : i32
    %c0_i32_0 = arith.constant 0 : i32
    return %arg0, %c0_i32 : i32, i32
  }
  func.func @transform_3(%arg0: i32) -> (i32, i32) {
    %c0_i32 = arith.constant 0 : i32
    %c0_i32_0 = arith.constant 0 : i32
    return %arg0, %c0_i32 : i32, i32
  }
}

</mosaic_0001>

<bundles_post_ra>
// kernel: _rician_channel_impl.1
= control target key start
LH: loop header
LB: loop body
LE: loop exit
PB: predicated region body
PF: predicated region fallthrough
CT: control target
= control target key end

     0   :  { %s194_s1 = inlined_call_operand.vmem [shape: f32[8,512], index: 1, kind: input, shape index: {}]   ;;  %s195_s2 = inlined_call_operand.vmem [shape: f32[8,512], index: 2, kind: input, shape index: {}]   ;;  %s196_s0 = inlined_call_operand.vmem [shape: f32[8,512], index: 0, kind: input, shape index: {}]   ;;  %s197_s3 = inlined_call_operand.vmem [shape: f32[8,512], index: 3, kind: output, shape index: {}]  }
   0x1   :  { %v14_v0 = vld [vmem:[%s194_s1] sm:$0xff]  ;;  %v15_v4 = vld [vmem:[%s194_s1 + $0x8] sm:$0xff]  ;;  %v16_v8 = vld [vmem:[%s194_s1 + $0x10] sm:$0xff] }
   0x2   :  { %v22_v1 = vld [vmem:[%s195_s2] sm:$0xff]  ;;  %v18_v2 = vadd.f32 1.4142135, %v14_v0  ;;  %v23_v5 = vld [vmem:[%s195_s2 + $0x8] sm:$0xff]  ;;  %v19_v6 = vadd.f32 1.4142135, %v15_v4 }
   0x3   :  { %v30_v3 = vmul.f32 %v22_v1, %v22_v1  ;;  %v31_v7 = vmul.f32 %v23_v5, %v23_v5  ;;  %v24_v9 = vld [vmem:[%s195_s2 + $0x10] sm:$0xff]  ;;  %v20_v11 = vadd.f32 1.4142135, %v16_v8  ;;  %v17_v12 = vld [vmem:[%s194_s1 + $0x18] sm:$0xff]  ;;  %v86_v54 = vld [vmem:[%s196_s0] sm:$0xff] }
   0x4   :  { %v26_v10 = vmul.f32 %v18_v2, %v18_v2  ;;  %v25_v13 = vld [vmem:[%s195_s2 + $0x18] sm:$0xff]  ;;  %v27_v14 = vmul.f32 %v19_v6, %v19_v6  ;;  %v21_v15 = vadd.f32 1.4142135, %v17_v12  ;;  %v32_v18 = vmul.f32 %v24_v9, %v24_v9  ;;  %v87_v59 = vld [vmem:[%s196_s0 + $0x8] sm:$0xff]  ;;  %v88_v4 = vld [vmem:[%s196_s0 + $0x10] sm:$0xff] }
   0x5   :  { %v28_v17 = vmul.f32 %v20_v11, %v20_v11  ;;  %v33_v19 = vmul.f32 %v25_v13, %v25_v13  ;;  %v89_v8 = vld [vmem:[%s196_s0 + $0x18] sm:$0xff] }
   0x6   :  { %v34_v16 = vadd.f32 %v30_v3, %v26_v10  ;;  %v35_v20 = vadd.f32 %v31_v7, %v27_v14  ;;  %v29_v21 = vmul.f32 %v21_v15, %v21_v15 }
   0x7   :  { %v36_v22 = vadd.f32 %v32_v18, %v28_v17 }
   0x8   :  { %106 = vrsqrt.f32 %v34_v16  ;;  %v158_v23 = vadd.f32 %v33_v19, %v29_v21  ;;  %vm45_vm0 = vcmp.eq.f32.partialorder %v34_v16, inf  ;;  %vm47_vm1 = vcmp.eq.f32.partialorder %v34_v16, 0.0 }
   0x9   :  { %108 = vrsqrt.f32 %v35_v20  ;;  %v48_v42 = vand.u32 2147483648, %v34_v16  ;;  %vm57_vm2 = vcmp.eq.f32.partialorder %v35_v20, inf  ;;  %v60_v46 = vand.u32 2147483648, %v35_v20 }
   0xa   :  { %110 = vrsqrt.f32 %v36_v22  ;;  %vm59_vm3 = vcmp.eq.f32.partialorder %v35_v20, 0.0  ;;  %vm69_vm4 = vcmp.eq.f32.partialorder %v36_v22, inf  ;;  %vm71_vm5 = vcmp.eq.f32.partialorder %v36_v22, 0.0 }
   0xb   :  { %112 = vrsqrt.f32 %v158_v23  ;;  %v72_v52 = vand.u32 2147483648, %v36_v22  ;;  %vm81_vm6 = vcmp.eq.f32.partialorder %v158_v23, inf  ;;  %v84_v61 = vand.u32 2147483648, %v158_v23 }
   0xc   :  { %vm83_vm7 = vcmp.eq.f32.partialorder %v158_v23, 0.0 }
   0xe   :  { %v107_v24 = vpop.eup %106 }
   0xf   :  { %v109_v25 = vpop.eup %108  ;;  %v39_v26 = vmul.f32 %v107_v24, %v34_v16 }
  0x10   :  { %v51_v27 = vmul.f32 %v109_v25, %v35_v20  ;;  %v111_v29 = vpop.eup %110 }
  0x11   :  { %v40_v28 = vmul.f32 %v107_v24, %v39_v26  ;;  %v113_v31 = vpop.eup %112  ;;  %v63_v33 = vmul.f32 %v111_v29, %v36_v22 }
  0x12   :  { %v52_v30 = vmul.f32 %v109_v25, %v51_v27  ;;  %v75_v35 = vmul.f32 %v113_v31, %v158_v23 }
  0x13   :  { %v41_v32 = vmul.f32 0.5, %v40_v28  ;;  %v64_v37 = vmul.f32 %v111_v29, %v63_v33 }
  0x14   :  { %v53_v34 = vmul.f32 0.5, %v52_v30  ;;  %v76_v39 = vmul.f32 %v113_v31, %v75_v35 }
  0x15   :  { %v42_v36 = vsub.f32 1.5, %v41_v32  ;;  %v65_v41 = vmul.f32 0.5, %v64_v37 }
  0x16   :  { %v54_v38 = vsub.f32 1.5, %v53_v34  ;;  %v77_v44 = vmul.f32 0.5, %v76_v39 }
  0x17   :  { %v43_v40 = vmul.f32 %v107_v24, %v42_v36  ;;  %v66_v47 = vsub.f32 1.5, %v65_v41 }
  0x18   :  { %v55_v43 = vmul.f32 %v109_v25, %v54_v38  ;;  %v78_v49 = vsub.f32 1.5, %v77_v44 }
  0x19   :  { %v44_v45 = vmul.f32 %v43_v40, %v34_v16  ;;  %v67_v51 = vmul.f32 %v111_v29, %v66_v47 }
  0x1a   :  { %v56_v48 = vmul.f32 %v55_v43, %v35_v20  ;;  %v79_v56 = vmul.f32 %v113_v31, %v78_v49 }
  0x1b   :  { %v46_v50 = vsel %vm45_vm0, %v34_v16, %v44_v45  ;;  %v68_v60 = vmul.f32 %v67_v51, %v36_v22 }
  0x1c   :  { %v49_v53 = vsel %vm47_vm1, %v48_v42, %v46_v50  ;;  %v58_v55 = vsel %vm57_vm2, %v35_v20, %v56_v48  ;;  %v80_v63 = vmul.f32 %v79_v56, %v158_v23 }
  0x1d   :  { %v90_v57 = vmul.f32 0.057735026, %v49_v53  ;;  %v61_v58 = vsel %vm59_vm3, %v60_v46, %v58_v55  ;;  %v70_v1 = vsel %vm69_vm4, %v36_v22, %v68_v60 }
  0x1e   :  { %v91_v62 = vmul.f32 0.057735026, %v61_v58  ;;  %v73_v3 = vsel %vm71_vm5, %v72_v52, %v70_v1  ;;  %v82_v5 = vsel %vm81_vm6, %v158_v23, %v80_v63 }
  0x1f   :  { %v94_v0 = vadd.f32 %v90_v57, %v86_v54  ;;  %v92_v6 = vmul.f32 0.057735026, %v73_v3  ;;  %v85_v7 = vsel %vm83_vm7, %v84_v61, %v82_v5 }
  0x20   :  { %v95_v2 = vadd.f32 %v91_v62, %v87_v59  ;;  %v93_v9 = vmul.f32 0.057735026, %v85_v7 }
  0x21   :  { %98 = vst [vmem:[%s197_s3] sm:$0xff] %v94_v0  ;;  %v96_v10 = vadd.f32 %v92_v6, %v88_v4 }
  0x22   :  { %99 = vst [vmem:[%s197_s3 + $0x8] sm:$0xff] %v95_v2  ;;  %v97_v11 = vadd.f32 %v93_v9, %v89_v8 }
  0x23   :  { %100 = vst [vmem:[%s197_s3 + $0x10] sm:$0xff] %v96_v10 }
  0x24   :  { %101 = vst [vmem:[%s197_s3 + $0x18] sm:$0xff] %v97_v11 }

</bundles_post_ra>
